<compile_context>
chip_gen: v5e
topology: v5e:2x2
jax: 0.10.0
libtpu: 0.0.40
codegen_flags: <defaults>
</compile_context>

<pallas_src>
import jax
import jax.numpy as jnp
from jax.experimental import pallas as pl
from jax.experimental.pallas import tpu as pltpu

_NEG_SLOPE = 0.01


def _leaky_relu(x, slope=_NEG_SLOPE):
    return jnp.where(x >= 0, x, slope * x)


def _round_up(x, m):
    return ((x + m - 1) // m) * m


def _vmem_capacity_bytes():
    try:
        info = pltpu.get_tpu_info()
        cap = getattr(info, "vmem_capacity_bytes", None)
        if cap:
            return int(cap)
    except Exception:
        pass
    return 64 * 1024 * 1024  # conservative (v7x-sized) fallback


def _choose_tile(n, two_e, e, in_bytes, budget_bytes):
    """Row-tile size (and grid length) for the pipelined path."""
    if n <= 1024:
        # Small problem: one full-extent block, no tiling constraints to satisfy.
        return max(n, 1), 1
    # Double-buffered input DMAs + in-kernel f32 copies + small f32 temporaries/output.
    per_row = 2 * (2 * two_e + e) * in_bytes      # pipeline buffers for the 3 inputs
    per_row += 4 * (2 * two_e + e)                # f32 upcast temporaries
    per_row += 8 * 4 * 4                          # (8, tile) f32 matmul/acc temps
    per_row += 2 * 8 * 4                          # (8, tile) output double buffer
    t = budget_bytes // max(per_row, 1)
    t = min(t, 4096)                              # >= ~2 MiB of input bytes per step
    t = min(t, _round_up(-(-n // 4), 128))        # keep >= ~4 grid steps (v7x megacore)
    t = max(128, (t // 128) * 128)                # lane-aligned output blocks
    return t, -(-n // t)


def dtr_kernel(x_lrn_ref, x_scn_ref, x_b_ref,
               w_p_ref, w_d_ref, w_b_ref, bias_ref, out_ref):
    f32 = jnp.float32
    # Upcast after load: HBM bytes stay in the producer dtype (bf16-friendly), compute
    # runs in f32 on every TPU generation.
    x_lrn = x_lrn_ref[...].astype(f32)
    x_scn = x_scn_ref[...].astype(f32)
    x_b = x_b_ref[...].astype(f32)

    # Each weight matrix is (8, D) with the head's weight vector in row 0 / 1 / 2 and
    # zeros elsewhere, so the three partial results sum into one lane-dense (8, tile_n)
    # block: row 0 = p_lrn, row 1 = d_scn, row 2 = beta_scn.
    def head(w_ref, x):
        return jnp.einsum("od,nd->on", w_ref[...], x,
                          preferred_element_type=f32,
                          precision=jax.lax.Precision.HIGHEST)

    s = head(w_p_ref, x_lrn) + head(w_d_ref, x_scn) + head(w_b_ref, x_b)
    s = s + bias_ref[...]                          # (8, 1) broadcast over lanes
    out_ref[...] = _leaky_relu(s).astype(out_ref.dtype)


def dtr_forward(h_lrn_cpt, h_scn_cpt, h_scn, params):
    """params: w_p (1,2E), b_p (1,1), w_d (1,2E), b_d (1,1), w_b (1,E), b_b (1,1)."""
    B, S, two_e = h_lrn_cpt.shape
    e = h_scn.shape[-1]
    N = B * S
    f32 = jnp.float32

    x_lrn = h_lrn_cpt.reshape(N, two_e)
    x_scn = h_scn_cpt.reshape(N, two_e)
    x_b = h_scn.reshape(N, e)

    # Embed the three 1-row weight vectors into sublane-aligned 8-row matrices
    # (row 0 = w_p, row 1 = w_d, row 2 = w_b) and the biases into one (8,1) column.
    # These are a few KB; building them is negligible next to the activation reads.
    w_p8 = jnp.zeros((8, two_e), f32).at[0].set(params["w_p"].astype(f32)[0])
    w_d8 = jnp.zeros((8, two_e), f32).at[1].set(params["w_d"].astype(f32)[0])
    w_b8 = jnp.zeros((8, e), f32).at[2].set(params["w_b"].astype(f32)[0])
    bias8 = (jnp.zeros((8, 1), f32)
             .at[0, 0].set(params["b_p"].astype(f32)[0, 0])
             .at[1, 0].set(params["b_d"].astype(f32)[0, 0])
             .at[2, 0].set(params["b_b"].astype(f32)[0, 0]))

    out_dtype = jnp.promote_types(h_lrn_cpt.dtype, params["w_p"].dtype)

    # Generation-aware VMEM budget (v7x has 64 MiB physical, v5e/v6e 128 MiB).
    vmem_cap = _vmem_capacity_bytes()
    vmem_limit = min((vmem_cap * 5) // 8, 72 * 1024 * 1024)
    in_bytes = jnp.dtype(h_lrn_cpt.dtype).itemsize
    tile_n, grid_n = _choose_tile(N, two_e, e, in_bytes, vmem_limit - (4 << 20))

    in_specs = [
        pl.BlockSpec((tile_n, two_e), lambda i: (i, 0)),   # x_lrn
        pl.BlockSpec((tile_n, two_e), lambda i: (i, 0)),   # x_scn
        pl.BlockSpec((tile_n, e), lambda i: (i, 0)),       # x_b
        pl.BlockSpec((8, two_e), lambda i: (0, 0)),        # w_p8 (VMEM-resident)
        pl.BlockSpec((8, two_e), lambda i: (0, 0)),        # w_d8
        pl.BlockSpec((8, e), lambda i: (0, 0)),            # w_b8
        pl.BlockSpec((8, 1), lambda i: (0, 0)),            # bias column
    ]
    out_spec = pl.BlockSpec((8, tile_n), lambda i: (0, i))
    out_shape = jax.ShapeDtypeStruct((8, N), out_dtype)

    out = pl.pallas_call(
        dtr_kernel,
        grid=(grid_n,),
        in_specs=in_specs,
        out_specs=out_spec,
        out_shape=out_shape,
        compiler_params=pltpu.CompilerParams(
            dimension_semantics=("parallel",),
            vmem_limit_bytes=vmem_limit,
        ),
    )(x_lrn, x_scn, x_b, w_p8, w_d8, w_b8, bias8)

    p_lrn = out[0].reshape(B, S)
    d_scn = out[1].reshape(B, S)
    beta_scn = out[2].reshape(B, S)
    return p_lrn, d_scn, beta_scn


def init_dtr_params(key, embedding_dim):
    """Deterministic init mimicking nn.Linear default (U(-1/sqrt(fan_in), +...))."""
    k1, k2, k3, k4, k5, k6 = jax.random.split(key, 6)
    two_e = 2 * embedding_dim

    def u(k, shape, fan_in):
        bound = 1.0 / jnp.sqrt(fan_in)
        return jax.random.uniform(k, shape, jnp.float32, -bound, bound)

    return {
        "w_p": u(k1, (1, two_e), two_e),
        "b_p": u(k2, (1, 1), two_e),
        "w_d": u(k3, (1, two_e), two_e),
        "b_d": u(k4, (1, 1), two_e),
        "w_b": u(k5, (1, embedding_dim), embedding_dim),
        "b_b": u(k6, (1, 1), embedding_dim),
    }


def dtr_reference(h_lrn_cpt, h_scn_cpt, h_scn, params):
    def head(x, w, b):
        y = jnp.einsum("bsd,od->bso", x.astype(jnp.float32), w.astype(jnp.float32),
                       precision=jax.lax.Precision.HIGHEST) + b.astype(jnp.float32)[0]
        return _leaky_relu(y).squeeze(-1)

    return (
        head(h_lrn_cpt, params["w_p"], params["b_p"]),
        head(h_scn_cpt, params["w_d"], params["b_d"]),
        head(h_scn, params["w_b"], params["b_b"]),
    )


def _check(name, got, ref, atol):
    assert got.shape == ref.shape, (name, got.shape, ref.shape)
    assert jnp.allclose(got.astype(jnp.float32), ref, atol=atol, rtol=atol), name


if __name__ == "__main__":
    fwd = jax.jit(dtr_forward)

    # --- Test 1: small shapes (single full-extent block path) ---
    B, S, E = 2, 8, 32  # batch, sequence, embedding_dim
    key = jax.random.PRNGKey(0)
    k_in1, k_in2, k_in3, k_param = jax.random.split(key, 4)

    h_lrn_cpt = jax.random.normal(k_in1, (B, S, 2 * E), jnp.float32)
    h_scn_cpt = jax.random.normal(k_in2, (B, S, 2 * E), jnp.float32)
    h_scn = jax.random.normal(k_in3, (B, S, E), jnp.float32)
    params = init_dtr_params(k_param, E)

    p_lrn, d_scn, beta_scn = jax.block_until_ready(
        fwd(h_lrn_cpt, h_scn_cpt, h_scn, params)
    )
    ref_p, ref_d, ref_b = dtr_reference(h_lrn_cpt, h_scn_cpt, h_scn, params)
    _check("p_lrn", p_lrn, ref_p, 1e-3)
    _check("d_scn", d_scn, ref_d, 1e-3)
    _check("beta_scn", beta_scn, ref_b, 1e-3)

    # --- Test 2: ragged multi-tile path + bf16 activations (halved HBM reads) ---
    B2, S2 = 3, 437  # N = 1311 -> tiled grid with a ragged (masked) last block
    k1, k2, k3 = jax.random.split(jax.random.PRNGKey(1), 3)
    h1 = jax.random.normal(k1, (B2, S2, 2 * E), jnp.bfloat16)
    h2 = jax.random.normal(k2, (B2, S2, 2 * E), jnp.bfloat16)
    h3 = jax.random.normal(k3, (B2, S2, E), jnp.bfloat16)
    o1, o2, o3 = jax.block_until_ready(fwd(h1, h2, h3, params))
    r1, r2, r3 = dtr_reference(h1, h2, h3, params)
    _check("p_lrn_bf16", o1, r1, 2e-3)
    _check("d_scn_bf16", o2, r2, 2e-3)
    _check("beta_scn_bf16", o3, r3, 2e-3)

    print("KERNEL_OK")
</pallas_src>

<mosaic_0001>
module attributes {stable_mosaic.version = 11 : i64} {
  func.func @dtr_kernel(%arg0: i32, %arg1: memref<16x64xf32, #tpu.memory_space<vmem>>, %arg2: memref<16x64xf32, #tpu.memory_space<vmem>>, %arg3: memref<16x32xf32, #tpu.memory_space<vmem>>, %arg4: memref<8x64xf32, #tpu.memory_space<vmem>>, %arg5: memref<8x64xf32, #tpu.memory_space<vmem>>, %arg6: memref<8x32xf32, #tpu.memory_space<vmem>>, %arg7: memref<8x1xf32, #tpu.memory_space<vmem>>, %arg8: memref<8x16xf32, #tpu.memory_space<vmem>>) attributes {dimension_semantics = [#tpu.dimension_semantics<parallel>], iteration_bounds = array<i64: 1>, scalar_prefetch = 0 : i64, scratch_operands = 0 : i64, tpu.core_type = #tpu.core_type<tc>, window_params = [{transform_indices = @transform_0, window_bounds = array<i64: 16, 64>}, {transform_indices = @transform_1, window_bounds = array<i64: 16, 64>}, {transform_indices = @transform_2, window_bounds = array<i64: 16, 32>}, {pipeline_mode = #tpu.pipeline_mode<synchronous>, transform_indices = @transform_3, window_bounds = array<i64: 8, 64>}, {pipeline_mode = #tpu.pipeline_mode<synchronous>, transform_indices = @transform_4, window_bounds = array<i64: 8, 64>}, {pipeline_mode = #tpu.pipeline_mode<synchronous>, transform_indices = @transform_5, window_bounds = array<i64: 8, 32>}, {pipeline_mode = #tpu.pipeline_mode<synchronous>, transform_indices = @transform_6, window_bounds = array<i64: 8, 1>}, {transform_indices = @transform_7, window_bounds = array<i64: 8, 16>}]} {
    %c0 = arith.constant 0 : index
    %c0_0 = arith.constant 0 : index
    %0 = vector.load %arg1[%c0, %c0_0] : memref<16x64xf32, #tpu.memory_space<vmem>>, vector<16x64xf32>
    %c0_1 = arith.constant 0 : index
    %c0_2 = arith.constant 0 : index
    %1 = vector.load %arg2[%c0_1, %c0_2] : memref<16x64xf32, #tpu.memory_space<vmem>>, vector<16x64xf32>
    %c0_3 = arith.constant 0 : index
    %c0_4 = arith.constant 0 : index
    %2 = vector.load %arg3[%c0_3, %c0_4] : memref<16x32xf32, #tpu.memory_space<vmem>>, vector<16x32xf32>
    %c0_5 = arith.constant 0 : index
    %c0_6 = arith.constant 0 : index
    %3 = vector.load %arg4[%c0_5, %c0_6] : memref<8x64xf32, #tpu.memory_space<vmem>>, vector<8x64xf32>
    "tpu.trace_start"() <{level = 10 : i32, message = "od,nd->on"}> : () -> ()
    %cst = arith.constant dense<0.000000e+00> : vector<8x16xf32>
    %4 = tpu.matmul %3, %0, %cst {dimension_numbers = #tpu.dot_dimension_numbers<[1], [1], [0], [0], [0, 0, 1, 0], [], []>, precision = #tpu.contract_precision<fp32>} : vector<8x64xf32>, vector<16x64xf32>, vector<8x16xf32> -> vector<8x16xf32>
    "tpu.trace_stop"() : () -> ()
    %c0_7 = arith.constant 0 : index
    %c0_8 = arith.constant 0 : index
    %5 = vector.load %arg5[%c0_7, %c0_8] : memref<8x64xf32, #tpu.memory_space<vmem>>, vector<8x64xf32>
    "tpu.trace_start"() <{level = 10 : i32, message = "od,nd->on"}> : () -> ()
    %cst_9 = arith.constant dense<0.000000e+00> : vector<8x16xf32>
    %6 = tpu.matmul %5, %1, %cst_9 {dimension_numbers = #tpu.dot_dimension_numbers<[1], [1], [0], [0], [0, 0, 1, 0], [], []>, precision = #tpu.contract_precision<fp32>} : vector<8x64xf32>, vector<16x64xf32>, vector<8x16xf32> -> vector<8x16xf32>
    "tpu.trace_stop"() : () -> ()
    %7 = arith.addf %4, %6 : vector<8x16xf32>
    %c0_10 = arith.constant 0 : index
    %c0_11 = arith.constant 0 : index
    %8 = vector.load %arg6[%c0_10, %c0_11] : memref<8x32xf32, #tpu.memory_space<vmem>>, vector<8x32xf32>
    "tpu.trace_start"() <{level = 10 : i32, message = "od,nd->on"}> : () -> ()
    %cst_12 = arith.constant dense<0.000000e+00> : vector<8x16xf32>
    %9 = tpu.matmul %8, %2, %cst_12 {dimension_numbers = #tpu.dot_dimension_numbers<[1], [1], [0], [0], [0, 0, 1, 0], [], []>, precision = #tpu.contract_precision<fp32>} : vector<8x32xf32>, vector<16x32xf32>, vector<8x16xf32> -> vector<8x16xf32>
    "tpu.trace_stop"() : () -> ()
    %10 = arith.addf %7, %9 : vector<8x16xf32>
    %c0_13 = arith.constant 0 : index
    %c0_14 = arith.constant 0 : index
    %11 = vector.load %arg7[%c0_13, %c0_14] : memref<8x1xf32, #tpu.memory_space<vmem>>, vector<8x1xf32>
    %12 = vector.broadcast %11 : vector<8x1xf32> to vector<8x16xf32>
    %13 = arith.addf %10, %12 : vector<8x16xf32>
    %cst_15 = arith.constant 0.000000e+00 : f32
    %14 = vector.broadcast %cst_15 : f32 to vector<8x16xf32>
    %15 = arith.cmpf oge, %13, %14 : vector<8x16xf32>
    %cst_16 = arith.constant 0.00999999977 : f32
    %16 = vector.broadcast %cst_16 : f32 to vector<8x16xf32>
    %17 = arith.mulf %16, %13 : vector<8x16xf32>
    %18 = arith.select %15, %13, %17 : vector<8x16xi1>, vector<8x16xf32>
    %c0_17 = arith.constant 0 : index
    %c0_18 = arith.constant 0 : index
    %19 = vector.load %arg8[%c0_17, %c0_18] : memref<8x16xf32, #tpu.memory_space<vmem>>, vector<8x16xf32>
    tpu.vector_store %arg8[%c0_17, %c0_18], %18 {strides = array<i32>} : memref<8x16xf32, #tpu.memory_space<vmem>>, vector<8x16xf32>,
    return
  }
  func.func @transform_0(%arg0: i32) -> (i32, i32) {
    %c0_i32 = arith.constant 0 : i32
    %c0_i32_0 = arith.constant 0 : i32
    return %arg0, %c0_i32 : i32, i32
  }
  func.func @transform_1(%arg0: i32) -> (i32, i32) {
    %c0_i32 = arith.constant 0 : i32
    %c0_i32_0 = arith.constant 0 : i32
    return %arg0, %c0_i32 : i32, i32
  }
  func.func @transform_2(%arg0: i32) -> (i32, i32) {
    %c0_i32 = arith.constant 0 : i32
    %c0_i32_0 = arith.constant 0 : i32
    return %arg0, %c0_i32 : i32, i32
  }
  func.func @transform_3(%arg0: i32) -> (i32, i32) {
    %c0_i32 = arith.constant 0 : i32
    %c0_i32_0 = arith.constant 0 : i32
    %c0_i32_1 = arith.constant 0 : i32
    return %c0_i32, %c0_i32_0 : i32, i32
  }
  func.func @transform_4(%arg0: i32) -> (i32, i32) {
    %c0_i32 = arith.constant 0 : i32
    %c0_i32_0 = arith.constant 0 : i32
    %c0_i32_1 = arith.constant 0 : i32
    return %c0_i32, %c0_i32_0 : i32, i32
  }
  func.func @transform_5(%arg0: i32) -> (i32, i32) {
    %c0_i32 = arith.constant 0 : i32
    %c0_i32_0 = arith.constant 0 : i32
    %c0_i32_1 = arith.constant 0 : i32
    return %c0_i32, %c0_i32_0 : i32, i32
  }
  func.func @transform_6(%arg0: i32) -> (i32, i32) {
    %c0_i32 = arith.constant 0 : i32
    %c0_i32_0 = arith.constant 0 : i32
    %c0_i32_1 = arith.constant 0 : i32
    return %c0_i32, %c0_i32_0 : i32, i32
  }
  func.func @transform_7(%arg0: i32) -> (i32, i32) {
    %c0_i32 = arith.constant 0 : i32
    %c0_i32_0 = arith.constant 0 : i32
    return %c0_i32, %arg0 : i32, i32
  }
}

</mosaic_0001>

<bundles_post_ra>
// kernel: squeeze.17
= control target key start
LH: loop header
LB: loop body
LE: loop exit
PB: predicated region body
PF: predicated region fallthrough
CT: control target
= control target key end

     0   :  { %s80_s0 = inlined_call_operand.vmem [shape: f32[16], index: 0, kind: input, shape index: {}]   ;;  %s81_s1 = inlined_call_operand.hbm [shape: f32[2,8], index: 1, kind: output, shape index: {}]  }
   0x1   :  { %v5_v0 = vld [vmem:[%s80_s0] sm:$0x1] }
   0x2   :  { %2 = vsyncpa [#allocation1], 0  ;;  %6 = vst [vmem:[#allocation3] sm:$0x1] %v5_v0  ;;  %vm8_vm0 = vcmask 64512   ;;  %s62_s0 = smov 120  }
   0x3   :  { %s63_s8 = smov [#allocation0]   ;;  %s27_s1 = sshll.u32 %s81_s1, 4  ;;  %s28_s1 = int_to_ptr.hbm [resolvable:$true] %s27_s1 }
   0x4   :  { %s25_s9 = sshll.u32 %s63_s8, 4  ;;  %s26_s9 = int_to_ptr.vmem [resolvable:$true] %s25_s9 }
   0x9   :  { %v10_v1 = vld [vmem:[#allocation3] sm:$0x1]  }
   0xa   :  { %v7_v2 = vld [vmem:[#allocation3] sm:$0x1]   ;;  %11 = vrot.lane.b32.xlu0 %v10_v1, %s62_s0 }
   0xb   :  { %9 = vst.msk [vmem:[#allocation2] sm:$0x1] %vm8_vm0, %v7_v2  }
  0x7c   :  { %v12_v3 = vpop.permute.xlu0 %11  }
  0x7d   :  { %15 = vst.msk [vmem:[#allocation2 + $0x1] sm:$0x1] %vm8_vm0, %v12_v3  }
  0x84   :  { %v18_v4 = vld [vmem:[#allocation2] sm:$0x3] }
  0x85   :  { %21 = vst [vmem:[#allocation0] sm:$0x3] %v18_v4 }
  0x86   :  { %30 = dma.vmem_to_hbm [thread:$0]  %s26_s9, 32, %s28_s1, [#allocation1]  }
  0x87   :  { %60 = dma.done.wait [#allocation1], 32  }
  0x88   :  { %61 = vsyncadd [#allocation1], 4294967264 }
  0x89   :  { %33 = vsyncpa [#allocation1], 1 }

// kernel: dtr_forward.1
= control target key start
LH: loop header
LB: loop body
LE: loop exit
PB: predicated region body
PF: predicated region fallthrough
CT: control target
= control target key end

     0   :  { %12 = vsyncpa [#allocation3], 0  ;;  %s606_s27 = smov [#allocation2]   ;;  %s607_s29 = smov 128   ;;  %s734_s0 = inlined_call_operand.vmem [shape: f32[16,64], index: 0, kind: input, shape index: {}]   ;;  %s735_s1 = inlined_call_operand.vmem [shape: f32[16,64], index: 1, kind: input, shape index: {}]   ;;  %s736_s2 = inlined_call_operand.hbm [shape: f32[16,32], index: 2, kind: input, shape index: {}]   ;;  %s737_s3 = inlined_call_operand.vmem [shape: f32[8,64], index: 3, kind: input, shape index: {}]   ;;  %s738_s4 = inlined_call_operand.vmem [shape: f32[8,64], index: 4, kind: input, shape index: {}]   ;;  %s739_s5 = inlined_call_operand.vmem [shape: f32[8,32], index: 5, kind: input, shape index: {}]   ;;  %s740_s6 = inlined_call_operand.vmem [shape: f32[8,1], index: 6, kind: input, shape index: {}]   ;;  %s741_s7 = inlined_call_operand.vmem [shape: f32[8,16], index: 7, kind: output, shape index: {}]  }
   0x1   :  { %s21_s26 = sshll.u32 %s736_s2, 4  ;;  %s23_s28 = sshll.u32 %s606_s27, 4  ;;  %s22_s26 = int_to_ptr.hbm [resolvable:$true] %s21_s26  ;;  %s24_s28 = int_to_ptr.vmem [resolvable:$true] %s23_s28 }
   0x2   :  { %s608_s30 = smov 8  }
   0x3   :  { %29 = dma.hbm_to_vmem [thread:$0]  %s22_s26, 256, %s24_s28, [#allocation3], %s607_s29, %s607_s29, %s608_s30  }
   0x4   :  { %604 = dma.done.wait [#allocation3], 256  }
   0x5   :  { %605 = vsyncadd [#allocation3], 4294967040  ;;  %vm50_vm0 = vcmask 523264   ;;  %v45_v0 = vld [vmem:[%s735_s1 + $0x8] sm:$0xff]  ;;  %v44_v1 = vld [vmem:[%s735_s1] sm:$0xff]  ;;  %vm388_vm1 = vcmask 261120  }
   0x6   :  { %v49_v2 = vld [vmem:[%s738_s4] sm:$0xff]  ;;  %v58_v3 = vsel %vm50_vm0, %v45_v0, 0  ;;  %v55_v4 = vsel %vm50_vm0, %v44_v1, 0  ;;  %v43_v6 = vld [vmem:[%s734_s0 + $0x8] sm:$0xff]  ;;  %v609_v61 = vmov 0   ;;  %vm568_vm2 = vcmask 130048  }
   0x7   :  { %v52_v5 = vsel %vm50_vm0, %v49_v2, 0  ;;  %v42_v7 = vld [vmem:[%s734_s0] sm:$0xff]  ;;  %v74_v9 = vand.u32 4294901760, %v58_v3  ;;  %v674_v10 = vand.u32 4294901760, %v55_v4  ;;  %v226_v12 = vsel %vm50_vm0, %v43_v6, 0  ;;  %v47_v13 = vld [vmem:[#allocation2 + $0x8] sm:$0xff]  ;;  %579 = vset.pattern.permute.xlu0 %v609_v61 }
   0x8   :  { %v48_v8 = vld [vmem:[%s737_s3] sm:$0xff]  ;;  %v676_v11 = vand.u32 4294901760, %v52_v5  ;;  %v679_v14 = vand.u32 4294901760, %v226_v12  ;;  %v223_v15 = vsel %vm50_vm0, %v42_v7, 0  ;;  %v396_v17 = vsel %vm388_vm1, %v47_v13, 0 }
   0x9   :  { %v220_v16 = vsel %vm50_vm0, %v48_v8, 0  ;;  %v102_v18 = vsub.f32 %v58_v3, %v74_v9  ;;  %75 = vmatpush.xpose.msra.mxu0 %v74_v9  ;;  %159 = vmatpush.xpose.msra.mxu3 %v74_v9  ;;  %v108_v19 = vsub.f32 %v55_v4, %v674_v10  ;;  %v686_v21 = vand.u32 4294901760, %v223_v15  ;;  %v46_v31 = vld [vmem:[#allocation2] sm:$0xff] }
   0xa   :  { %v79_v20 = vsub.f32 %v52_v5, %v676_v11  ;;  %v270_v22 = vsub.f32 %v226_v12, %v679_v14  ;;  %v689_v23 = vand.u32 4294901760, %v220_v16  ;;  %v695_v30 = vand.u32 4294901760, %v396_v17  ;;  %v387_v42 = vld [vmem:[%s739_s5] sm:$0xff] }
   0xb   :  { %134 = vmatpush.xpose.msra.mxu2 %v102_v18  ;;  %v103_v24 = vand.u32 4294901760, %v102_v18  ;;  %v109_v25 = vand.u32 4294901760, %v108_v19  ;;  %v276_v27 = vsub.f32 %v223_v15, %v686_v21  ;;  %v393_v41 = vsel %vm388_vm1, %v46_v31, 0  ;;  %v558_v57 = vld [vmem:[%s740_s6] sm:$0xff] }
   0xc   :  { %v80_v26 = vand.u32 4294901760, %v79_v20  ;;  %v271_v28 = vand.u32 4294901760, %v270_v22  ;;  %v693_v29 = vsub.f32 %v220_v16, %v689_v23  ;;  %v440_v45 = vsub.f32 %v396_v17, %v695_v30  ;;  %561 = vperm.xlu0 %579, %v558_v57  }
   0xd   :  { %v104_v32 = vsub.f32 %v102_v18, %v103_v24  ;;  %77 = vmatpush.xpose.msra.mxu0 %v674_v10  ;;  %161 = vmatpush.xpose.msra.mxu3 %v674_v10  ;;  %v110_v33 = vsub.f32 %v108_v19, %v109_v25  ;;  %v277_v35 = vand.u32 4294901760, %v276_v27  ;;  %v414_v48 = vand.u32 4294901760, %v393_v41 }
   0xe   :  { %v81_v34 = vsub.f32 %v79_v20, %v80_v26  ;;  %v272_v36 = vsub.f32 %v270_v22, %v271_v28  ;;  %v248_v37 = vand.u32 4294901760, %v693_v29  ;;  %v390_v49 = vsel %vm388_vm1, %v387_v42, 0 }
   0xf   :  { %v105_v38 = vand.u32 4294901760, %v104_v32  ;;  %137 = vmatpush.xpose.msra.mxu2 %v108_v19  ;;  %v278_v40 = vsub.f32 %v276_v27, %v277_v35  ;;  %v111_v44 = vand.u32 4294901760, %v110_v33  ;;  %v416_v50 = vand.u32 4294901760, %v390_v49 }
  0x10   :  { %v82_v39 = vand.u32 4294901760, %v81_v34  ;;  %165 = vmatmul.f32.vlgmr.msra.gmra.mxu3 %v80_v26  ;;  %v273_v43 = vand.u32 4294901760, %v272_v36  ;;  %v249_v47 = vsub.f32 %v693_v29, %v248_v37  ;;  %v441_v52 = vand.u32 4294901760, %v440_v45 }
  0x11   :  { %186 = vmatpush.xpose.msrb.mxu0 %v103_v24  ;;  %106 = vmatpush.xpose.msra.mxu1 %v105_v38  ;;  %v279_v46 = vand.u32 4294901760, %v278_v40  ;;  %v446_v53 = vsub.f32 %v393_v41, %v414_v48  ;;  %v417_v54 = vsub.f32 %v390_v49, %v416_v50 }
  0x12   :  { %83 = vmatmul.f32.vlgmr.msra.gmra.mxu0 %v82_v39  ;;  %140 = vmatmul.f32.vlgmr.msra.gmra.mxu2 %v79_v20  ;;  %v250_v51 = vand.u32 4294901760, %v249_v47  ;;  %v442_v55 = vsub.f32 %v440_v45, %v441_v52 }
  0x13   :  { %243 = vmatpush.xpose.msrb.mxu2 %v679_v14  ;;  %274 = vmatpush.xpose.msrb.mxu3 %v273_v43  ;;  %v447_v56 = vand.u32 4294901760, %v446_v53  ;;  %v418_v58 = vand.u32 4294901760, %v417_v54 }
  0x14   :  { %v443_v59 = vand.u32 4294901760, %v442_v55 }
  0x15   :  { %190 = vmatpush.xpose.msrb.mxu0 %v109_v25  ;;  %112 = vmatpush.xpose.msra.mxu1 %v111_v44  ;;  %v448_v60 = vsub.f32 %v446_v53, %v447_v56  ;;  %v419_v62 = vsub.f32 %v417_v54, %v418_v58 }
  0x17   :  { %245 = vmatpush.xpose.msrb.mxu2 %v686_v21  ;;  %280 = vmatpush.xpose.msrb.mxu3 %v279_v46  ;;  %v449_v63 = vand.u32 4294901760, %v448_v60  ;;  %v420_v0 = vand.u32 4294901760, %v419_v62 }
  0x18   :  { %114 = vmatmul.f32.vlgmr.msra.gmra.mxu1 %v676_v11 }
  0x19   :  { %302 = vmatpush.xpose.msra.mxu0 %v270_v22  ;;  %211 = vmatpush.xpose.msrb.mxu1 %v74_v9 }
  0x1a   :  { %192 = vmatmul.f32.vlgmr.msrb.gmra.mxu0 %v676_v11  ;;  %282 = vmatmul.f32.vlgmr.msrb.gmra.mxu3 %v689_v23 }
  0x1b   :  { %354 = vmatpush.xpose.msra.mxu2 %v271_v28  ;;  %379 = vmatpush.xpose.msra.mxu3 %v679_v14 }
  0x1c   :  { %251 = vmatmul.f32.vlgmr.msrb.gmra.mxu2 %v250_v51 }
  0x1d   :  { %305 = vmatpush.xpose.msra.mxu0 %v276_v27  ;;  %213 = vmatpush.xpose.msrb.mxu1 %v674_v10 }
  0x1f   :  { %358 = vmatpush.xpose.msra.mxu2 %v277_v35  ;;  %381 = vmatpush.xpose.msra.mxu3 %v686_v21 }
  0x20   :  { %215 = vmatmul.f32.vlgmr.msrb.gmra.mxu1 %v676_v11 }
  0x21   :  { %327 = vmatpush.xpose.msra.mxu1 %v679_v14  ;;  %413 = vmatpush.xpose.msrb.mxu0 %v695_v30 }
  0x22   :  { %308 = vmatmul.f32.vlgmr.msra.gmra.mxu0 %v693_v29  ;;  %383 = vmatmul.f32.vlgmr.msra.gmra.mxu3 %v689_v23 }
  0x23   :  { %472 = vmatpush.xpose.msrb.mxu2 %v440_v45  ;;  %497 = vmatpush.xpose.msrb.mxu3 %v695_v30 }
  0x24   :  { %360 = vmatmul.f32.vlgmr.msra.gmra.mxu2 %v689_v23 }
  0x25   :  { %329 = vmatpush.xpose.msra.mxu1 %v686_v21  ;;  %415 = vmatpush.xpose.msrb.mxu0 %v414_v48 }
  0x27   :  { %475 = vmatpush.xpose.msrb.mxu2 %v446_v53  ;;  %499 = vmatpush.xpose.msrb.mxu3 %v414_v48 }
  0x28   :  { %333 = vmatmul.f32.vlgmr.msra.gmra.mxu1 %v248_v37 }
  0x29   :  { %444 = vmatpush.xpose.msrb.mxu1 %v443_v59  ;;  %524 = vmatpush.xpose.msra.mxu0 %v441_v52 }
  0x2a   :  { %421 = vmatmul.f32.vlgmr.msrb.gmra.mxu0 %v420_v0  ;;  %503 = vmatmul.f32.vlgmr.msrb.gmra.mxu3 %v418_v58 }
  0x2c   :  { %478 = vmatmul.f32.vlgmr.msrb.gmra.mxu2 %v417_v54 }
  0x2d   :  { %450 = vmatpush.xpose.msrb.mxu1 %v449_v63  ;;  %528 = vmatpush.xpose.msra.mxu0 %v447_v56 }
  0x30   :  { %452 = vmatmul.f32.vlgmr.msrb.gmra.mxu1 %v416_v50 }
  0x31   :  { %549 = vmatpush.xpose.msra.mxu1 %v695_v30 }
  0x32   :  { %530 = vmatmul.f32.vlgmr.msra.gmra.mxu0 %v416_v50 }
  0x35   :  { %551 = vmatpush.xpose.msra.mxu1 %v414_v48 }
  0x38   :  { %553 = vmatmul.f32.vlgmr.msra.gmra.mxu1 %v416_v50 }
  0x7e   :  { %v562_v35 = vpop.permute.xlu0 %561 }
  0x8f   :  { %v84_v1 = vpop.f32.mrf.mxu0 }
  0x93   :  { %v166_v2 = vpop.f32.mrf.mxu3 }
  0x95   :  { %v115_v3 = vpop.f32.mrf.mxu1  ;;  %v141_v4 = vpop.f32.mrf.mxu2 }
  0x96   :  { %v116_v5 = vadd.f32 %v115_v3, %v84_v1 }
  0x97   :  { %v193_v6 = vpop.f32.mrf.mxu0 }
  0x98   :  { %v142_v7 = vadd.f32 %v141_v4, %v116_v5 }
  0x9a   :  { %v167_v8 = vadd.f32 %v166_v2, %v142_v7 }
  0x9c   :  { %v194_v9 = vadd.f32 %v193_v6, %v167_v8 }
  0x9d   :  { %v283_v10 = vpop.f32.mrf.mxu3  ;;  %v216_v11 = vpop.f32.mrf.mxu1 }
  0x9e   :  { %v217_v13 = vadd.f32 %v216_v11, %v194_v9 }
  0x9f   :  { %v252_v12 = vpop.f32.mrf.mxu2  ;;  %v309_v14 = vpop.f32.mrf.mxu0 }
  0xa0   :  { %v253_v15 = vadd.f32 %v252_v12, %v217_v13 }
  0xa2   :  { %v284_v19 = vadd.f32 %v283_v10, %v253_v15 }
  0xa4   :  { %v310_v21 = vadd.f32 %v309_v14, %v284_v19 }
  0xa5   :  { %v384_v16 = vpop.f32.mrf.mxu3  ;;  %v334_v17 = vpop.f32.mrf.mxu1 }
  0xa6   :  { %v335_v24 = vadd.f32 %v334_v17, %v310_v21 }
  0xa7   :  { %v361_v18 = vpop.f32.mrf.mxu2  ;;  %v422_v20 = vpop.f32.mrf.mxu0 }
  0xa8   :  { %v362_v29 = vadd.f32 %v361_v18, %v335_v24 }
  0xaa   :  { %v385_v33 = vadd.f32 %v384_v16, %v362_v29 }
  0xad   :  { %v453_v22 = vpop.f32.mrf.mxu1  ;;  %v504_v26 = vpop.f32.mrf.mxu3 }
  0xae   :  { %v454_v25 = vadd.f32 %v453_v22, %v422_v20 }
  0xaf   :  { %v479_v23 = vpop.f32.mrf.mxu2  ;;  %v531_v28 = vpop.f32.mrf.mxu0 }
  0xb0   :  { %v480_v27 = vadd.f32 %v479_v23, %v454_v25 }
  0xb2   :  { %v505_v30 = vadd.f32 %v504_v26, %v480_v27 }
  0xb4   :  { %v532_v31 = vadd.f32 %v531_v28, %v505_v30 }
  0xb5   :  { %v554_v32 = vpop.f32.mrf.mxu1 }
  0xb6   :  { %v555_v34 = vadd.f32 %v554_v32, %v532_v31 }
  0xb8   :  { %v557_v36 = vadd.f32 %v555_v34, %v385_v33 }
  0xba   :  { %v564_v37 = vadd.f32 %v562_v35, %v557_v36 }
  0xbc   :  { %vm565_vm3 = vcmp.ge.f32.partialorder %v564_v37, 0.0  ;;  %v566_v38 = vmul.f32 0.01, %v564_v37 }
  0xbe   :  { %v567_v39 = vsel %vm565_vm3, %v564_v37, %v566_v38 }
  0xbf   :  { %569 = vst.msk [vmem:[%s741_s7] sm:$0xff] %vm568_vm2, %v567_v39 }
  0xc0   :  { %574 = vsyncpa [#allocation3], 1 }

</bundles_post_ra>
